<compile_context>
chip_gen: v7x
topology: tpu7x:2x2x1
jax: 0.10.0
libtpu: 0.0.40
codegen_flags: <defaults>
</compile_context>

<pallas_src>
import jax
import jax.numpy as jnp
from jax.experimental import pallas as pl
from jax.experimental.pallas import tpu as pltpu


def _mean_pooling_kernel(h_ref, m_ref, o_ref, msk_ref):
    # h_ref : (Bt, Ts, H)  hidden-state tile, native dtype (bf16 / f32)
    # m_ref : (Bt, Ts)     float32 attention-mask tile (lane-dense)
    # o_ref : (Bt, H)      float32 output tile; resident across the S axis,
    #                      used directly as the sum_embeddings accumulator
    # msk_ref: (Bt, 1)     float32 sum_mask accumulator (scratch)
    si = pl.program_id(1)

    @pl.when(si == 0)
    def _init():
        o_ref[...] = jnp.zeros_like(o_ref)
        msk_ref[...] = jnp.zeros_like(msk_ref)

    h = h_ref[...].astype(jnp.float32)      # (Bt, Ts, H) promote once (VPU)
    m = m_ref[...]                          # (Bt, Ts) f32

    # VPU multiply + reduce over the sequence tile; f32 accumulation exactly
    # matches PyTorch's float() promotion (no bf16 mask cast anywhere).
    o_ref[...] += jnp.sum(h * m[:, :, None], axis=1)
    msk_ref[...] += jnp.sum(m, axis=-1, keepdims=True)

    @pl.when(si == pl.num_programs(1) - 1)
    def _finalize():
        denom = jnp.maximum(msk_ref[...], 1e-9)   # torch.clamp(min=1e-9)
        o_ref[...] = o_ref[...] / denom


def _vmem_budget():
    """(target bytes per hidden buffer, vmem_limit_bytes), generation-aware."""
    try:
        vmem_cap = pltpu.get_tpu_info().vmem_capacity_bytes
    except Exception:
        vmem_cap = 128 * 1024 * 1024
    if vmem_cap <= 64 * 1024 * 1024:
        # v7x: 64 MiB physical VMEM per TensorCore -> ~10 MiB tiles,
        # double-buffered hidden blocks stay ~20 MiB, limit at 48 MiB.
        return 10 * 1024 * 1024, 48 * 1024 * 1024
    # v5e / v6e: 128 MiB physical VMEM -> bigger tiles to amortize the
    # ~0.35 us/grid-step overhead down to a few percent of the stream time.
    return 16 * 1024 * 1024, 80 * 1024 * 1024


def _pick_batch_tile(B, target=16):
    """Batch rows per grid step.

    Prefer a multiple-of-8 divisor of B that leaves >= 2 blocks along the
    'parallel' batch axis (so v7x's two TensorCores both get work); fall back
    to the full batch when B cannot be split legally.
    """
    if B % 8 != 0:
        return B                              # cannot split legally
    cap = min(target, B // 2) if B >= 16 else B
    t = (cap // 8) * 8
    while t >= 8:
        if B % t == 0:
            return t
        t -= 8
    return B


def _pick_seq_tile(S, Bt, H, itemsize, target_bytes):
    """Sequence tile: full S when the hidden block is small enough, otherwise
    a multiple of 128 sized so one hidden buffer is ~<= target_bytes.  The
    wrapper zero-pads S up to a multiple of the tile, so no divisor search
    (and no full-S fallback slab) is needed."""
    if Bt * S * H * itemsize <= target_bytes:
        return S
    ts = (target_bytes // max(1, Bt * H * itemsize)) // 128 * 128
    ts = max(128, ts)
    return min(ts, pl.cdiv(S, 128) * 128)


def mean_pooling(last_hidden_state, attention_mask):
    """last_hidden_state: (B, S, H) float (bf16/f32); attention_mask: (B, S)."""
    B, S, H = last_hidden_state.shape
    h = last_hidden_state                     # keep native dtype (no upcast)
    m = attention_mask.astype(jnp.float32)    # tiny vs. h; exact mask math

    target_bytes, vmem_limit = _vmem_budget()
    Bt = _pick_batch_tile(B)
    Ts = _pick_seq_tile(S, Bt, H, h.dtype.itemsize, target_bytes)

    # Zero-pad the sequence axis to a multiple of the tile.  Padded positions
    # carry mask 0, so they contribute nothing to either sum (exact).
    S_pad = pl.cdiv(S, Ts) * Ts
    if S_pad != S:
        h = jnp.pad(h, ((0, 0), (0, S_pad - S), (0, 0)))
        m = jnp.pad(m, ((0, 0), (0, S_pad - S)))

    grid = (B // Bt, S_pad // Ts)

    cost = pl.CostEstimate(
        flops=2 * B * S_pad * H,
        transcendentals=0,
        bytes_accessed=B * S_pad * H * h.dtype.itemsize
        + B * S_pad * 4
        + B * H * 4,
    )

    out = pl.pallas_call(
        _mean_pooling_kernel,
        out_shape=jax.ShapeDtypeStruct((B, H), jnp.float32),
        grid_spec=pltpu.PrefetchScalarGridSpec(
            num_scalar_prefetch=0,
            grid=grid,
            in_specs=[
                pl.BlockSpec((Bt, Ts, H), lambda bi, si: (bi, si, 0)),
                pl.BlockSpec((Bt, Ts), lambda bi, si: (bi, si)),
            ],
            # Output block index is constant along the S axis -> resident
            # accumulator; written back to HBM once per batch tile.
            out_specs=pl.BlockSpec((Bt, H), lambda bi, si: (bi, 0)),
            scratch_shapes=[
                pltpu.VMEM((Bt, 1), jnp.float32),   # sum_mask accumulator
            ],
        ),
        compiler_params=pltpu.CompilerParams(
            dimension_semantics=("parallel", "arbitrary"),
            vmem_limit_bytes=vmem_limit,
        ),
        cost_estimate=cost,
    )(h, m)

    return out


if __name__ == "__main__":
    key = jax.random.PRNGKey(0)
    k1, k2 = jax.random.split(key)

    B, S, H = 2, 8, 32
    last_hidden_state = jax.random.normal(k1, (B, S, H), dtype=jnp.float32)
    # Binary attention mask with some padding positions zeroed out.
    attention_mask = (jax.random.uniform(k2, (B, S)) > 0.3).astype(jnp.int32)

    out = mean_pooling(last_hidden_state, attention_mask)
    out = jax.block_until_ready(out)

    # Reference check in plain JAX (same math as the PyTorch module).
    m = attention_mask.astype(jnp.float32)[:, :, None]
    ref = jnp.sum(last_hidden_state * m, axis=1) / jnp.maximum(
        jnp.sum(m, axis=1), 1e-9
    )
    assert out.shape == (B, H)
    assert jnp.allclose(out, ref, atol=1e-5, rtol=1e-5)

    print("KERNEL_OK")
</pallas_src>

<mosaic_0001>
module attributes {stable_mosaic.version = 11 : i64} {
  func.func @_mean_pooling_kernel(%arg0: i32, %arg1: i32, %arg2: memref<2x8x32xf32, #tpu.memory_space<vmem>>, %arg3: memref<2x8xf32, #tpu.memory_space<vmem>>, %arg4: memref<2x32xf32, #tpu.memory_space<vmem>>, %arg5: memref<2x1xf32, #tpu.memory_space<vmem>>) attributes {dimension_semantics = [#tpu.dimension_semantics<parallel>, #tpu.dimension_semantics<arbitrary>], iteration_bounds = array<i64: 1, 1>, scalar_prefetch = 0 : i64, scratch_operands = 1 : i64, tpu.core_type = #tpu.core_type<tc>, window_params = [{transform_indices = @transform_0, window_bounds = array<i64: 2, 8, 32>}, {transform_indices = @transform_1, window_bounds = array<i64: 2, 8>}, {transform_indices = @transform_2, window_bounds = array<i64: 2, 32>}]} {
    %c0_i32 = arith.constant 0 : i32
    %0 = arith.cmpi eq, %arg1, %c0_i32 : i32
    %1 = arith.extui %0 : i1 to i32
    %c0_i32_0 = arith.constant 0 : i32
    %2 = arith.cmpi ne, %1, %c0_i32_0 : i32
    scf.if %2 {
      %cst_16 = arith.constant 0.000000e+00 : f32
      %20 = vector.broadcast %cst_16 : f32 to vector<2x32xf32>
      %c0_17 = arith.constant 0 : index
      %c0_18 = arith.constant 0 : index
      %21 = vector.load %arg4[%c0_17, %c0_18] : memref<2x32xf32, #tpu.memory_space<vmem>>, vector<2x32xf32>
      tpu.vector_store %arg4[%c0_17, %c0_18], %20 {strides = array<i32>} : memref<2x32xf32, #tpu.memory_space<vmem>>, vector<2x32xf32>,
      %cst_19 = arith.constant 0.000000e+00 : f32
      %22 = vector.broadcast %cst_19 : f32 to vector<2x1xf32>
      %c0_20 = arith.constant 0 : index
      %c0_21 = arith.constant 0 : index
      %23 = vector.load %arg5[%c0_20, %c0_21] : memref<2x1xf32, #tpu.memory_space<vmem>>, vector<2x1xf32>
      tpu.vector_store %arg5[%c0_20, %c0_21], %22 {strides = array<i32>} : memref<2x1xf32, #tpu.memory_space<vmem>>, vector<2x1xf32>,
    } else {
    }
    %c0 = arith.constant 0 : index
    %c0_1 = arith.constant 0 : index
    %c0_2 = arith.constant 0 : index
    %3 = vector.load %arg2[%c0, %c0_1, %c0_2] : memref<2x8x32xf32, #tpu.memory_space<vmem>>, vector<2x8x32xf32>
    %c0_3 = arith.constant 0 : index
    %c0_4 = arith.constant 0 : index
    %4 = vector.load %arg3[%c0_3, %c0_4] : memref<2x8xf32, #tpu.memory_space<vmem>>, vector<2x8xf32>
    %c0_5 = arith.constant 0 : index
    %c0_6 = arith.constant 0 : index
    %5 = vector.load %arg4[%c0_5, %c0_6] : memref<2x32xf32, #tpu.memory_space<vmem>>, vector<2x32xf32>
    %6 = vector.shape_cast %4 : vector<2x8xf32> to vector<2x8x1xf32>
    %7 = vector.broadcast %6 : vector<2x8x1xf32> to vector<2x8x32xf32>
    %8 = arith.mulf %3, %7 : vector<2x8x32xf32>
    %cst = arith.constant dense<0.000000e+00> : vector<2x32xf32>
    %9 = vector.multi_reduction <add>, %8, %cst [1] : vector<2x8x32xf32> to vector<2x32xf32>
    %10 = arith.addf %5, %9 : vector<2x32xf32>
    %c0_7 = arith.constant 0 : index
    %c0_8 = arith.constant 0 : index
    %11 = vector.load %arg4[%c0_7, %c0_8] : memref<2x32xf32, #tpu.memory_space<vmem>>, vector<2x32xf32>
    tpu.vector_store %arg4[%c0_7, %c0_8], %10 {strides = array<i32>} : memref<2x32xf32, #tpu.memory_space<vmem>>, vector<2x32xf32>,
    %c0_9 = arith.constant 0 : index
    %c0_10 = arith.constant 0 : index
    %12 = vector.load %arg5[%c0_9, %c0_10] : memref<2x1xf32, #tpu.memory_space<vmem>>, vector<2x1xf32>
    %cst_11 = arith.constant dense<0.000000e+00> : vector<2xf32>
    %13 = vector.multi_reduction <add>, %4, %cst_11 [1] : vector<2x8xf32> to vector<2xf32>
    %14 = vector.shape_cast %13 : vector<2xf32> to vector<2x1xf32>
    %15 = arith.addf %12, %14 : vector<2x1xf32>
    %c0_12 = arith.constant 0 : index
    %c0_13 = arith.constant 0 : index
    %16 = vector.load %arg5[%c0_12, %c0_13] : memref<2x1xf32, #tpu.memory_space<vmem>>, vector<2x1xf32>
    tpu.vector_store %arg5[%c0_12, %c0_13], %15 {strides = array<i32>} : memref<2x1xf32, #tpu.memory_space<vmem>>, vector<2x1xf32>,
    %c0_i32_14 = arith.constant 0 : i32
    %17 = arith.cmpi eq, %arg1, %c0_i32_14 : i32
    %18 = arith.extui %17 : i1 to i32
    %c0_i32_15 = arith.constant 0 : i32
    %19 = arith.cmpi ne, %18, %c0_i32_15 : i32
    scf.if %19 {
      %c0_16 = arith.constant 0 : index
      %c0_17 = arith.constant 0 : index
      %20 = vector.load %arg5[%c0_16, %c0_17] : memref<2x1xf32, #tpu.memory_space<vmem>>, vector<2x1xf32>
      %cst_18 = arith.constant 9.99999971E-10 : f32
      %21 = vector.broadcast %cst_18 : f32 to vector<2x1xf32>
      %22 = arith.maximumf %20, %21 : vector<2x1xf32>
      %c0_19 = arith.constant 0 : index
      %c0_20 = arith.constant 0 : index
      %23 = vector.load %arg4[%c0_19, %c0_20] : memref<2x32xf32, #tpu.memory_space<vmem>>, vector<2x32xf32>
      %24 = vector.broadcast %22 : vector<2x1xf32> to vector<2x32xf32>
      %25 = arith.divf %23, %24 : vector<2x32xf32>
      %c0_21 = arith.constant 0 : index
      %c0_22 = arith.constant 0 : index
      %26 = vector.load %arg4[%c0_21, %c0_22] : memref<2x32xf32, #tpu.memory_space<vmem>>, vector<2x32xf32>
      tpu.vector_store %arg4[%c0_21, %c0_22], %25 {strides = array<i32>} : memref<2x32xf32, #tpu.memory_space<vmem>>, vector<2x32xf32>,
    } else {
    }
    return
  }
  func.func @transform_0(%arg0: i32, %arg1: i32) -> (i32, i32, i32) {
    %c0_i32 = arith.constant 0 : i32
    %c0_i32_0 = arith.constant 0 : i32
    return %arg0, %arg1, %c0_i32 : i32, i32, i32
  }
  func.func @transform_1(%arg0: i32, %arg1: i32) -> (i32, i32) {
    %c0_i32 = arith.constant 0 : i32
    return %arg0, %arg1 : i32, i32
  }
  func.func @transform_2(%arg0: i32, %arg1: i32) -> (i32, i32) {
    %c0_i32 = arith.constant 0 : i32
    %c0_i32_0 = arith.constant 0 : i32
    return %arg0, %c0_i32 : i32, i32
  }
}

</mosaic_0001>

<bundles_post_ra>
// kernel: tpu_custom_call.1
= control target key start
LH: loop header
LB: loop body
LE: loop exit
PB: predicated region body
PF: predicated region fallthrough
CT: control target
= control target key end

     0   :  { %7 = vsyncpa [#allocation4], 0  ;;  %s273_s0 = inlined_call_operand.hbm [shape: f32[2,8,32], index: 0, kind: input, shape index: {}]   ;;  %s274_s1 = inlined_call_operand.hbm [shape: f32[2,8], index: 1, kind: input, shape index: {}]   ;;  %s275_s2 = inlined_call_operand.hbm [shape: f32[2,32], index: 2, kind: output, shape index: {}]  }
   0x1   :  { %8 = vsyncpa [#allocation7], 0 }
   0x2   :  { %9 = vsyncpa [#allocation5], 0  ;;  %s210_s9 = smov [#allocation3]   ;;  %s138_s13 = scalar_lea.hbm %s273_s0, 256 }
   0x3   :  { %s15_s10 = sshll.u32 %s210_s9, 4  ;;  %p139_p0 = scmp.ne.s32.totalorder %s273_s0, %s138_s13  ;;  %s16_s10 = int_to_ptr.vmem [resolvable:$true] %s15_s10 }
   0x4   :  { %p142_p1 = scmp.lt.u32.totalorder %s138_s13, %s273_s0 }
   0x6   :  { %p144_p2 = pnand %p142_p1, %p139_p0 }
   0x8   :  { %147 = shalt.err (!%p144_p2)
}
   0x9   :  { %s148_s18 = scalar_lea.vmem %s16_s10, 256  ;;  %p153_p4 = scmp.lt.s32.totalorder %s16_s10, %s16_s10 }
   0xa   :  { %p149_p3 = scmp.ne.s32.totalorder %s16_s10, %s148_s18  ;;  %p154_p5 = scmp.lt.s32.totalorder %s148_s18, %s148_s18 }
   0xc   :  { %p155_p6 = por %p154_p5, %p153_p4 }
   0xe   :  { %p156_p7 = pnand %p155_p6, %p149_p3 }
  0x10   :  { %159 = shalt.err (!%p156_p7)
}
  0x11   :  { %s211_s19 = smov 128   ;;  %s212_s20 = smov 8  }
  0x12   :  { %21 = dma.hbm_to_vmem [thread:$0]  %s273_s0, 256, %s16_s10, [#allocation4], %s211_s19, %s211_s19, %s212_s20  }
  0x13   :  { %s213_s23 = smov [#allocation6]   ;;  %s160_s27 = scalar_lea.hbm %s274_s1, 32 }
  0x14   :  { %s28_s24 = sshll.u32 %s213_s23, 4  ;;  %p161_p8 = scmp.ne.s32.totalorder %s274_s1, %s160_s27  ;;  %s29_s24 = int_to_ptr.vmem [resolvable:$true] %s28_s24 }
  0x15   :  { %p164_p9 = scmp.lt.u32.totalorder %s160_s27, %s274_s1 }
  0x17   :  { %p166_p10 = pnand %p164_p9, %p161_p8 }
  0x19   :  { %169 = shalt.err (!%p166_p10)
}
  0x1a   :  { %s170_s4 = scalar_lea.vmem %s29_s24, 32  ;;  %p175_p12 = scmp.lt.s32.totalorder %s29_s24, %s29_s24 }
  0x1b   :  { %p171_p11 = scmp.ne.s32.totalorder %s29_s24, %s170_s4  ;;  %p176_p13 = scmp.lt.s32.totalorder %s170_s4, %s170_s4 }
  0x1d   :  { %p177_p0 = por %p176_p13, %p175_p12 }
  0x1f   :  { %p178_p1 = pnand %p177_p0, %p171_p11 }
  0x21   :  { %181 = shalt.err (!%p178_p1)
}
  0x22   :  { %31 = dma.hbm_to_vmem [thread:$0]  %s274_s1, 32, %s29_s24, [#allocation7]  }
  0x23   :  { %204 = dma.done.wait [#allocation4], 256  }
  0x24   :  { %205 = vsyncadd [#allocation4], 4294967040 }
  0x25   :  { %206 = dma.done.wait [#allocation7], 32  }
  0x26   :  { %207 = vsyncadd [#allocation7], 4294967264  ;;  %vm44_vm0 = vcmask 1024   ;;  %v214_v0 = vmov 0.0   ;;  %vm90_vm1 = vcmask 58368   ;;  %v50_v3 = vlaneseq  ;;  %v47_v10 = vld [vmem:[#allocation3 + $0x8] sm:$0xff] }
  0x27   :  { %45 = vst.msk [vmem:[#allocation2] sm:$0x3] %vm44_vm0, %v214_v0  ;;  %v48_v1 = vld [vmem:[#allocation6] sm:$0x3]  ;;  %v215_v8 = vmov 0   ;;  %vm42_vm2 = vcmask 254976  }
  0x28   :  { %v91_v2 = vsel %vm90_vm1, %v48_v1, 0.0  ;;  %v51_v4 = vshrl.u32 %v50_v3, 7  ;;  %134 = vset.pattern.permute.xlu1 %v215_v8  ;;  %135 = vset.pattern.permute.xlu0 %v215_v8  ;;  %43 = vst.msk [vmem:[#allocation8] sm:$0x3] %vm42_vm2, %v214_v0  ;;  %vm66_vm3 = vcmask 261120   ;;  %v46_v19 = vld [vmem:[#allocation3] sm:$0xff] }
  0x29   :  { %92 = vadd.xlane.f32.xlu0 %v91_v2  ;;  %vm83_vm4 = vcmask 1041409   ;;  %s216_s1 = smov [#allocation8]  }
  0x2a   :  { %v59_v5 = vsub.s32 1, %v51_v4  ;;  %v52_v7 = vsub.s32 0, %v51_v4  ;;  %s117_s6 = sshll.u32 %s216_s1, 4  ;;  %s118_s6 = int_to_ptr.vmem [resolvable:$true] %s117_s6 }
  0x2b   :  { %s182_s7 = scalar_lea.vmem %s118_s6, 32  ;;  %p187_p3 = scmp.lt.s32.totalorder %s118_s6, %s118_s6 }
  0x2c   :  { %v60_v6 = vrot.slane %v48_v1, %v59_v5  ;;  %v53_v9 = vrot.slane %v48_v1, %v52_v7  ;;  %p183_p2 = scmp.ne.s32.totalorder %s118_s6, %s182_s7  ;;  %p188_p4 = scmp.lt.s32.totalorder %s182_s7, %s182_s7 }
  0x2e   :  { %62 = vbcast.lane.b32.xlu1 %v60_v6, 256  ;;  %v89_v15 = vld [vmem:[#allocation2] sm:$0x3]  ;;  %p189_p5 = por %p188_p4, %p187_p3 }
  0x2f   :  { %v49_v34 = vld [vmem:[#allocation8] sm:$0x3] }
  0x30   :  { %p190_p6 = pnand %p189_p5, %p183_p2 }
  0x3f   :  { %55 = vbcast.lane.b32.xlu0 %v53_v9, 256 }
  0xa0   :  { %v63_v11 = vpop.permute.xlu1 %62 }
  0xa1   :  { %v65_v12 = vmul.f32 %v63_v11, %v47_v10 }
  0xa3   :  { %v74_v13 = vsel %vm66_vm3, %v65_v12, 0.0 }
  0xa4   :  { %v75_v14 = vrot.slane %v74_v13, 4 }
  0xa6   :  { %v76_v17 = vadd.f32 %v75_v14, %v74_v13 }
  0xa8   :  { %v77_v20 = vrot.slane %v76_v17, 2 }
  0xaa   :  { %v78_v24 = vadd.f32 %v77_v20, %v76_v17 }
  0xac   :  { %v79_v29 = vrot.slane %v78_v24, 1 }
  0xae   :  { %v80_v32 = vadd.f32 %v79_v29, %v78_v24 }
  0xb6   :  { %v93_v16 = vpop.xlane.xlu0 %92 }
  0xb7   :  { %v94_v18 = vadd.f32 %v93_v16, %v89_v15 }
  0xb9   :  { %96 = vst.msk [vmem:[#allocation2] sm:$0x3] %vm44_vm0, %v94_v18 }
  0xba   :  { %v56_v21 = vpop.permute.xlu0 %55 }
  0xbb   :  { %v64_v22 = vmul.f32 %v56_v21, %v46_v19 }
  0xbd   :  { %v67_v23 = vsel %vm66_vm3, %v64_v22, 0.0 }
  0xbe   :  { %v68_v25 = vrot.slane %v67_v23, 4 }
  0xc0   :  { %v100_v26 = vld [vmem:[#allocation2] sm:$0x3]  ;;  %v69_v27 = vadd.f32 %v68_v25, %v67_v23 }
  0xc1   :  { %v101_v28 = vmax.f32 %v100_v26, 1e-09 }
  0xc2   :  { %v70_v30 = vrot.slane %v69_v27, 2 }
  0xc3   :  { %105 = vperm.xlu1 %134, %v101_v28  }
  0xc4   :  { %v71_v31 = vadd.f32 %v70_v30, %v69_v27 }
  0xc6   :  { %v72_v33 = vrot.slane %v71_v31, 1 }
  0xc8   :  { %v73_v35 = vadd.f32 %v72_v33, %v71_v31 }
  0xca   :  { %v84_v36 = vsel %vm83_vm4, %v80_v32, %v73_v35 }
  0xcb   :  { %v86_v37 = vadd.f32 %v84_v36, %v49_v34 }
  0xcd   :  { %88 = vst.msk [vmem:[#allocation8] sm:$0x3] %vm42_vm2, %v86_v37 }
  0xd4   :  { %v102_v40 = vld [vmem:[#allocation8] sm:$0x3] }
 0x142   :  { %v106_v38 = vpop.permute.xlu1 %105 }
 0x143   :  { %136 = vrcp.f32 %v106_v38 }
 0x14d   :  { %v137_v39 = vpop.eup %136 }
 0x14e   :  { %v109_v41 = vmul.f32 %v137_v39, %v102_v40 }
 0x150   :  { %110 = vst.msk [vmem:[#allocation8] sm:$0x3] %vm42_vm2, %v109_v41 }
 0x151   :  { %193 = shalt.err (!%p190_p6)
}
 0x152   :  { %s194_s10 = scalar_lea.hbm %s275_s2, 32 }
 0x153   :  { %p195_p7 = scmp.ne.s32.totalorder %s275_s2, %s194_s10  ;;  %p198_p8 = scmp.lt.u32.totalorder %s194_s10, %s275_s2 }
 0x155   :  { %p200_p9 = pnand %p198_p8, %p195_p7 }
 0x157   :  { %203 = shalt.err (!%p200_p9)
}
 0x158   :  { %120 = dma.vmem_to_hbm [thread:$0]  %s118_s6, 32, %s275_s2, [#allocation5]  }
 0x159   :  { %208 = dma.done.wait [#allocation5], 32  }
 0x15a   :  { %209 = vsyncadd [#allocation5], 4294967264 }
 0x15b   :  { %124 = vsyncpa [#allocation4], 1 }
 0x15c   :  { %125 = vsyncpa [#allocation7], 1 }
 0x15d   :  { %126 = vsyncpa [#allocation5], 1 }

</bundles_post_ra>
